<compile_context>
chip_gen: v6e
topology: v6e:2x2x1
jax: 0.10.0
libtpu: 0.0.40
codegen_flags: <defaults>
</compile_context>

<pallas_src>
from functools import partial

import jax
import jax.numpy as jnp
from jax import lax
from jax.experimental import pallas as pl
from jax.experimental.pallas import tpu as pltpu


def _sepconv_kernel(xpad_ref, wdw_ref, dwb_ref, wpt_ref, ptb_ref, out_ref,
                    *scratch, h_tile, w_out, ksize, stride, dilation,
                    relu_first):
    t = pl.program_id(1)
    r0 = pl.multiple_of(t * (h_tile * stride), h_tile * stride)
    cp_in = xpad_ref.shape[-1]
    h_in = (h_tile - 1) * stride + (ksize - 1) * dilation + 1

    if relu_first:
        # relu(pad(x)) == pad(relu(x)).  Apply the ReLU once per tile into a
        # VMEM scratch slab; the k*k tap windows then read it with static
        # offsets (no per-tap relu, no whole-tile vreg materialization).
        xbuf_ref = scratch[0]
        xbuf_ref[...] = jnp.maximum(
            xpad_ref[pl.ds(r0, h_in), :, :], 0.0).astype(xbuf_ref.dtype)

        def window(kh, kw):
            hs, ws = kh * dilation, kw * dilation
            if stride == 1:
                return xbuf_ref[pl.ds(hs, h_tile), pl.ds(ws, w_out), :]
            return xbuf_ref[pl.ds(hs, h_tile, stride),
                            pl.ds(ws, w_out, stride), :]
    else:
        def window(kh, kw):
            hs = r0 + kh * dilation
            ws = kw * dilation
            if stride == 1:
                return xpad_ref[pl.ds(hs, h_tile),
                                pl.ds(ws, w_out), :].astype(jnp.float32)
            return xpad_ref[pl.ds(hs, h_tile, stride),
                            pl.ds(ws, w_out, stride), :].astype(jnp.float32)

    # Depthwise conv: k*k shifted multiply-accumulates on the VPU.  The BN
    # scale is already folded into wdw.
    acc = None
    for kh in range(ksize):
        for kw in range(ksize):
            tap = window(kh, kw) * wdw_ref[kh * ksize + kw, :].astype(jnp.float32)
            acc = tap if acc is None else acc + tap

    if relu_first:
        # Depthwise-BN bias folded into the pointwise bias in the wrapper.
        y = acc
    else:
        y = jnp.maximum(acc + dwb_ref[0, :].astype(jnp.float32), 0.0)

    # Pointwise 1x1 conv == channel matmul on the MXU (bf16 in, f32 acc).
    z = jnp.dot(y.reshape(h_tile * w_out, cp_in).astype(jnp.bfloat16),
                wpt_ref[...],
                preferred_element_type=jnp.float32)
    z = z + ptb_ref[0, :].astype(jnp.float32)
    if not relu_first:
        z = jnp.maximum(z, 0.0)

    out_ref[...] = z.reshape(h_tile, w_out, -1).astype(out_ref.dtype)


def _round_up(n, m):
    return (n + m - 1) // m * m


def _largest_divisor_at_most(n, cap):
    for t in range(min(cap, n), 0, -1):
        if n % t == 0:
            return t
    return 1


def separable_conv2d(x_nchw, params, *, kernel_size=3, stride=1, dilation=1,
                     relu_first=True, eps=1e-5, h_tile=None):
    """x_nchw: (B, Cin, H, W) float32.  Returns (B, Cout, Hout, Wout)."""
    B, Cin, H, W = x_nchw.shape
    w_dw = params["w_dw"]                       # (Cin, 1, k, k)
    w_pt = params["w_pt"]                       # (Cout, Cin, 1, 1)
    Cout = w_pt.shape[0]
    k = kernel_size
    pad = dilation                              # matches nn.Conv2d(padding=dilation)

    Hout = (H + 2 * pad - dilation * (k - 1) - 1) // stride + 1
    Wout = (W + 2 * pad - dilation * (k - 1) - 1) // stride + 1

    Cp_in = _round_up(Cin, 128)
    Cp_out = _round_up(Cout, 128)

    if h_tile is None:
        # Keep the f32 accumulator (~h_tile*Wout rows of 128 lanes) near 16
        # vregs so acc + tap window + matmul result avoid register spills.
        h_cap = max(1, 128 // max(Wout, 1))
        h_tile = _largest_divisor_at_most(Hout, h_cap)
    assert Hout % h_tile == 0

    h_in = (h_tile - 1) * stride + (k - 1) * dilation + 1

    # ---- glue: layout + channel padding + BN folding (plain JAX) ----
    x_nhwc = jnp.transpose(x_nchw, (0, 2, 3, 1))
    x_pad = jnp.pad(x_nhwc, ((0, 0), (pad, pad), (pad, pad), (0, Cp_in - Cin)))
    Hpad, Wpad = H + 2 * pad, W + 2 * pad

    dw_scale = params["bn_d_gamma"] / jnp.sqrt(params["bn_d_var"] + eps)
    dw_bias = params["bn_d_beta"] - params["bn_d_mean"] * dw_scale
    pt_scale = params["bn_p_gamma"] / jnp.sqrt(params["bn_p_var"] + eps)
    pt_bias = params["bn_p_beta"] - params["bn_p_mean"] * pt_scale

    # Fold BN scales into the conv weights.
    wdw = jnp.transpose(w_dw[:, 0], (1, 2, 0)) * dw_scale            # (k, k, Cin)
    wdw = jnp.pad(wdw, ((0, 0), (0, 0), (0, Cp_in - Cin)))
    wdw = wdw.reshape(k * k, Cp_in).astype(jnp.float32)

    wpt_f32 = jnp.transpose(w_pt[:, :, 0, 0], (1, 0)) * pt_scale[None, :]  # (Cin, Cout)
    wpt_f32 = jnp.pad(wpt_f32, ((0, Cp_in - Cin), (0, Cp_out - Cout)))

    dwb_vec = jnp.pad(dw_bias, (0, Cp_in - Cin)).astype(jnp.float32)
    ptb_vec = jnp.pad(pt_bias, (0, Cp_out - Cout)).astype(jnp.float32)
    if relu_first:
        # No nonlinearity between depthwise-BN and pointwise conv, so fold the
        # depthwise bias through the 1x1 weights (exact, f32):
        #   (y + b_d) @ Wp + b_p == y @ Wp + (b_d @ Wp + b_p)
        ptb_vec = ptb_vec + dwb_vec @ wpt_f32

    wpt = wpt_f32.astype(jnp.bfloat16)
    dwb = dwb_vec.reshape(1, Cp_in)
    ptb = ptb_vec.reshape(1, Cp_out)

    kern = partial(_sepconv_kernel, h_tile=h_tile, w_out=Wout, ksize=k,
                   stride=stride, dilation=dilation, relu_first=relu_first)

    scratch_shapes = ((pltpu.VMEM((h_in, Wpad, Cp_in), jnp.float32),)
                      if relu_first else ())

    grid = (B, Hout // h_tile)
    out_pad = pl.pallas_call(
        kern,
        out_shape=jax.ShapeDtypeStruct((B, Hout, Wout, Cp_out), x_nchw.dtype),
        grid=grid,
        in_specs=[
            # Padded input: block index depends only on b -> fetched once per
            # batch and kept resident across the output-row tiles.
            pl.BlockSpec((None, Hpad, Wpad, Cp_in), lambda b, t: (b, 0, 0, 0)),
            pl.BlockSpec((k * k, Cp_in), lambda b, t: (0, 0)),
            pl.BlockSpec((1, Cp_in), lambda b, t: (0, 0)),
            pl.BlockSpec((Cp_in, Cp_out), lambda b, t: (0, 0)),
            pl.BlockSpec((1, Cp_out), lambda b, t: (0, 0)),
        ],
        out_specs=pl.BlockSpec((None, h_tile, Wout, Cp_out),
                               lambda b, t: (b, t, 0, 0)),
        scratch_shapes=scratch_shapes,
        compiler_params=pltpu.CompilerParams(
            dimension_semantics=("parallel", "parallel")),
    )(x_pad, wdw, dwb, wpt, ptb)

    out_nhwc = out_pad[..., :Cout]
    return jnp.transpose(out_nhwc, (0, 3, 1, 2))


def separable_conv2d_ref(x, params, *, kernel_size=3, stride=1, dilation=1,
                         relu_first=True, eps=1e-5):
    """Pure-JAX reference (NCHW), mirroring the PyTorch module in eval mode."""
    Cin = x.shape[1]

    def bn(h, g, b, m, v):
        sh = (1, -1, 1, 1)
        return (h - m.reshape(sh)) / jnp.sqrt(v.reshape(sh) + eps) \
            * g.reshape(sh) + b.reshape(sh)

    h = jnp.maximum(x, 0.0) if relu_first else x
    h = lax.conv_general_dilated(
        h, params["w_dw"], (stride, stride),
        [(dilation, dilation), (dilation, dilation)],
        rhs_dilation=(dilation, dilation), feature_group_count=Cin,
        dimension_numbers=("NCHW", "OIHW", "NCHW"))
    h = bn(h, params["bn_d_gamma"], params["bn_d_beta"],
           params["bn_d_mean"], params["bn_d_var"])
    if not relu_first:
        h = jnp.maximum(h, 0.0)
    h = lax.conv_general_dilated(
        h, params["w_pt"], (1, 1), [(0, 0), (0, 0)],
        dimension_numbers=("NCHW", "OIHW", "NCHW"))
    h = bn(h, params["bn_p_gamma"], params["bn_p_beta"],
           params["bn_p_mean"], params["bn_p_var"])
    if not relu_first:
        h = jnp.maximum(h, 0.0)
    return h


def make_params(key, inplanes, planes, kernel_size=3):
    ks = jax.random.split(key, 8)
    return {
        "w_dw": jax.random.normal(ks[0], (inplanes, 1, kernel_size, kernel_size),
                                  jnp.float32) * 0.2,
        "bn_d_gamma": 1.0 + 0.1 * jax.random.normal(ks[1], (inplanes,), jnp.float32),
        "bn_d_beta": 0.1 * jax.random.normal(ks[2], (inplanes,), jnp.float32),
        "bn_d_mean": 0.1 * jax.random.normal(ks[3], (inplanes,), jnp.float32),
        "bn_d_var": jnp.abs(jax.random.normal(ks[4], (inplanes,), jnp.float32)) + 0.5,
        "w_pt": jax.random.normal(ks[5], (planes, inplanes, 1, 1), jnp.float32) * 0.2,
        "bn_p_gamma": 1.0 + 0.1 * jax.random.normal(ks[6], (planes,), jnp.float32),
        "bn_p_beta": 0.1 * jax.random.normal(ks[7], (planes,), jnp.float32),
        "bn_p_mean": jnp.zeros((planes,), jnp.float32),
        "bn_p_var": jnp.ones((planes,), jnp.float32),
    }


if __name__ == "__main__":
    key = jax.random.PRNGKey(0)
    kx, kp = jax.random.split(key)

    B, Cin, Cout, H, W = 2, 4, 8, 16, 16
    x = jax.random.normal(kx, (B, Cin, H, W), jnp.float32)
    params = make_params(kp, Cin, Cout)

    ok = True
    for relu_first, dilation in ((True, 1), (False, 1), (True, 2)):
        out = separable_conv2d(x, params, dilation=dilation,
                               relu_first=relu_first)
        jax.block_until_ready(out)
        ref = separable_conv2d_ref(x, params, dilation=dilation,
                                   relu_first=relu_first)
        if out.shape != ref.shape:
            ok = False
        # bf16 MXU operands in the pointwise matmul -> slightly looser tol.
        if not jnp.allclose(out, ref, atol=2e-2, rtol=2e-2):
            ok = False

    if ok:
        print("KERNEL_OK")
    else:
        print("MISMATCH")
</pallas_src>

<mosaic_0001>
module attributes {stable_mosaic.version = 11 : i64} {
  func.func @_sepconv_kernel(%arg0: i32, %arg1: i32, %arg2: memref<1x18x18x128xf32, #tpu.memory_space<vmem>>, %arg3: memref<9x128xf32, #tpu.memory_space<vmem>>, %arg4: memref<1x128xf32, #tpu.memory_space<vmem>>, %arg5: memref<128x128xbf16, #tpu.memory_space<vmem>>, %arg6: memref<1x128xf32, #tpu.memory_space<vmem>>, %arg7: memref<1x8x16x128xf32, #tpu.memory_space<vmem>>, %arg8: memref<10x18x128xf32, #tpu.memory_space<vmem>>) attributes {dimension_semantics = [#tpu.dimension_semantics<parallel>, #tpu.dimension_semantics<parallel>], iteration_bounds = array<i64: 2, 2>, scalar_prefetch = 0 : i64, scratch_operands = 1 : i64, tpu.core_type = #tpu.core_type<tc>, window_params = [{transform_indices = @transform_0, window_bounds = array<i64: 1, 18, 18, 128>}, {pipeline_mode = #tpu.pipeline_mode<synchronous>, transform_indices = @transform_1, window_bounds = array<i64: 9, 128>}, {pipeline_mode = #tpu.pipeline_mode<synchronous>, transform_indices = @transform_2, window_bounds = array<i64: 1, 128>}, {pipeline_mode = #tpu.pipeline_mode<synchronous>, transform_indices = @transform_3, window_bounds = array<i64: 128, 128>}, {pipeline_mode = #tpu.pipeline_mode<synchronous>, transform_indices = @transform_4, window_bounds = array<i64: 1, 128>}, {transform_indices = @transform_5, window_bounds = array<i64: 1, 8, 16, 128>}]} {
    %c8_i32 = arith.constant 8 : i32
    %0 = arith.muli %arg1, %c8_i32 : i32
    %1 = tpu.assume_multiple %0, 8 : i32
    %c0 = arith.constant 0 : index
    %2 = arith.index_cast %1 : i32 to index
    %c0_0 = arith.constant 0 : index
    %c0_1 = arith.constant 0 : index
    %3 = vector.load %arg2[%c0, %2, %c0_0, %c0_1] : memref<1x18x18x128xf32, #tpu.memory_space<vmem>>, vector<1x10x18x128xf32>
    %4 = vector.shape_cast %3 : vector<1x10x18x128xf32> to vector<10x18x128xf32>
    %cst = arith.constant 0.000000e+00 : f32
    %5 = vector.broadcast %cst : f32 to vector<10x18x128xf32>
    %6 = arith.maximumf %4, %5 : vector<10x18x128xf32>
    %c0_2 = arith.constant 0 : index
    %c0_3 = arith.constant 0 : index
    %c0_4 = arith.constant 0 : index
    %7 = vector.load %arg8[%c0_2, %c0_3, %c0_4] : memref<10x18x128xf32, #tpu.memory_space<vmem>>, vector<10x18x128xf32>
    tpu.vector_store %arg8[%c0_2, %c0_3, %c0_4], %6 {strides = array<i32>} : memref<10x18x128xf32, #tpu.memory_space<vmem>>, vector<10x18x128xf32>,
    %c0_5 = arith.constant 0 : index
    %c0_6 = arith.constant 0 : index
    %c0_7 = arith.constant 0 : index
    %8 = vector.load %arg8[%c0_5, %c0_6, %c0_7] : memref<10x18x128xf32, #tpu.memory_space<vmem>>, vector<8x16x128xf32>
    %c0_8 = arith.constant 0 : index
    %c0_9 = arith.constant 0 : index
    %9 = vector.load %arg3[%c0_8, %c0_9] : memref<9x128xf32, #tpu.memory_space<vmem>>, vector<1x128xf32>
    %10 = vector.shape_cast %9 : vector<1x128xf32> to vector<128xf32>
    %11 = vector.shape_cast %10 : vector<128xf32> to vector<1x1x128xf32>
    %12 = vector.broadcast %11 : vector<1x1x128xf32> to vector<8x16x128xf32>
    %13 = arith.mulf %8, %12 : vector<8x16x128xf32>
    %c0_10 = arith.constant 0 : index
    %c1 = arith.constant 1 : index
    %c0_11 = arith.constant 0 : index
    %14 = vector.load %arg8[%c0_10, %c1, %c0_11] : memref<10x18x128xf32, #tpu.memory_space<vmem>>, vector<8x16x128xf32>
    %c1_12 = arith.constant 1 : index
    %c0_13 = arith.constant 0 : index
    %15 = vector.load %arg3[%c1_12, %c0_13] : memref<9x128xf32, #tpu.memory_space<vmem>>, vector<1x128xf32>
    %16 = vector.shape_cast %15 : vector<1x128xf32> to vector<128xf32>
    %17 = vector.shape_cast %16 : vector<128xf32> to vector<1x1x128xf32>
    %18 = vector.broadcast %17 : vector<1x1x128xf32> to vector<8x16x128xf32>
    %19 = arith.mulf %14, %18 : vector<8x16x128xf32>
    %20 = arith.addf %13, %19 : vector<8x16x128xf32>
    %c0_14 = arith.constant 0 : index
    %c2 = arith.constant 2 : index
    %c0_15 = arith.constant 0 : index
    %21 = vector.load %arg8[%c0_14, %c2, %c0_15] : memref<10x18x128xf32, #tpu.memory_space<vmem>>, vector<8x16x128xf32>
    %c2_16 = arith.constant 2 : index
    %c0_17 = arith.constant 0 : index
    %22 = vector.load %arg3[%c2_16, %c0_17] : memref<9x128xf32, #tpu.memory_space<vmem>>, vector<1x128xf32>
    %23 = vector.shape_cast %22 : vector<1x128xf32> to vector<128xf32>
    %24 = vector.shape_cast %23 : vector<128xf32> to vector<1x1x128xf32>
    %25 = vector.broadcast %24 : vector<1x1x128xf32> to vector<8x16x128xf32>
    %26 = arith.mulf %21, %25 : vector<8x16x128xf32>
    %27 = arith.addf %20, %26 : vector<8x16x128xf32>
    %c1_18 = arith.constant 1 : index
    %c0_19 = arith.constant 0 : index
    %c0_20 = arith.constant 0 : index
    %28 = vector.load %arg8[%c1_18, %c0_19, %c0_20] : memref<10x18x128xf32, #tpu.memory_space<vmem>>, vector<8x16x128xf32>
    %c3 = arith.constant 3 : index
    %c0_21 = arith.constant 0 : index
    %29 = vector.load %arg3[%c3, %c0_21] : memref<9x128xf32, #tpu.memory_space<vmem>>, vector<1x128xf32>
    %30 = vector.shape_cast %29 : vector<1x128xf32> to vector<128xf32>
    %31 = vector.shape_cast %30 : vector<128xf32> to vector<1x1x128xf32>
    %32 = vector.broadcast %31 : vector<1x1x128xf32> to vector<8x16x128xf32>
    %33 = arith.mulf %28, %32 : vector<8x16x128xf32>
    %34 = arith.addf %27, %33 : vector<8x16x128xf32>
    %c1_22 = arith.constant 1 : index
    %c1_23 = arith.constant 1 : index
    %c0_24 = arith.constant 0 : index
    %35 = vector.load %arg8[%c1_22, %c1_23, %c0_24] : memref<10x18x128xf32, #tpu.memory_space<vmem>>, vector<8x16x128xf32>
    %c4 = arith.constant 4 : index
    %c0_25 = arith.constant 0 : index
    %36 = vector.load %arg3[%c4, %c0_25] : memref<9x128xf32, #tpu.memory_space<vmem>>, vector<1x128xf32>
    %37 = vector.shape_cast %36 : vector<1x128xf32> to vector<128xf32>
    %38 = vector.shape_cast %37 : vector<128xf32> to vector<1x1x128xf32>
    %39 = vector.broadcast %38 : vector<1x1x128xf32> to vector<8x16x128xf32>
    %40 = arith.mulf %35, %39 : vector<8x16x128xf32>
    %41 = arith.addf %34, %40 : vector<8x16x128xf32>
    %c1_26 = arith.constant 1 : index
    %c2_27 = arith.constant 2 : index
    %c0_28 = arith.constant 0 : index
    %42 = vector.load %arg8[%c1_26, %c2_27, %c0_28] : memref<10x18x128xf32, #tpu.memory_space<vmem>>, vector<8x16x128xf32>
    %c5 = arith.constant 5 : index
    %c0_29 = arith.constant 0 : index
    %43 = vector.load %arg3[%c5, %c0_29] : memref<9x128xf32, #tpu.memory_space<vmem>>, vector<1x128xf32>
    %44 = vector.shape_cast %43 : vector<1x128xf32> to vector<128xf32>
    %45 = vector.shape_cast %44 : vector<128xf32> to vector<1x1x128xf32>
    %46 = vector.broadcast %45 : vector<1x1x128xf32> to vector<8x16x128xf32>
    %47 = arith.mulf %42, %46 : vector<8x16x128xf32>
    %48 = arith.addf %41, %47 : vector<8x16x128xf32>
    %c2_30 = arith.constant 2 : index
    %c0_31 = arith.constant 0 : index
    %c0_32 = arith.constant 0 : index
    %49 = vector.load %arg8[%c2_30, %c0_31, %c0_32] : memref<10x18x128xf32, #tpu.memory_space<vmem>>, vector<8x16x128xf32>
    %c6 = arith.constant 6 : index
    %c0_33 = arith.constant 0 : index
    %50 = vector.load %arg3[%c6, %c0_33] : memref<9x128xf32, #tpu.memory_space<vmem>>, vector<1x128xf32>
    %51 = vector.shape_cast %50 : vector<1x128xf32> to vector<128xf32>
    %52 = vector.shape_cast %51 : vector<128xf32> to vector<1x1x128xf32>
    %53 = vector.broadcast %52 : vector<1x1x128xf32> to vector<8x16x128xf32>
    %54 = arith.mulf %49, %53 : vector<8x16x128xf32>
    %55 = arith.addf %48, %54 : vector<8x16x128xf32>
    %c2_34 = arith.constant 2 : index
    %c1_35 = arith.constant 1 : index
    %c0_36 = arith.constant 0 : index
    %56 = vector.load %arg8[%c2_34, %c1_35, %c0_36] : memref<10x18x128xf32, #tpu.memory_space<vmem>>, vector<8x16x128xf32>
    %c7 = arith.constant 7 : index
    %c0_37 = arith.constant 0 : index
    %57 = vector.load %arg3[%c7, %c0_37] : memref<9x128xf32, #tpu.memory_space<vmem>>, vector<1x128xf32>
    %58 = vector.shape_cast %57 : vector<1x128xf32> to vector<128xf32>
    %59 = vector.shape_cast %58 : vector<128xf32> to vector<1x1x128xf32>
    %60 = vector.broadcast %59 : vector<1x1x128xf32> to vector<8x16x128xf32>
    %61 = arith.mulf %56, %60 : vector<8x16x128xf32>
    %62 = arith.addf %55, %61 : vector<8x16x128xf32>
    %c2_38 = arith.constant 2 : index
    %c2_39 = arith.constant 2 : index
    %c0_40 = arith.constant 0 : index
    %63 = vector.load %arg8[%c2_38, %c2_39, %c0_40] : memref<10x18x128xf32, #tpu.memory_space<vmem>>, vector<8x16x128xf32>
    %c8 = arith.constant 8 : index
    %c0_41 = arith.constant 0 : index
    %64 = vector.load %arg3[%c8, %c0_41] : memref<9x128xf32, #tpu.memory_space<vmem>>, vector<1x128xf32>
    %65 = vector.shape_cast %64 : vector<1x128xf32> to vector<128xf32>
    %66 = vector.shape_cast %65 : vector<128xf32> to vector<1x1x128xf32>
    %67 = vector.broadcast %66 : vector<1x1x128xf32> to vector<8x16x128xf32>
    %68 = arith.mulf %63, %67 : vector<8x16x128xf32>
    %69 = arith.addf %62, %68 : vector<8x16x128xf32>
    %70 = vector.shape_cast %69 : vector<8x16x128xf32> to vector<128x128xf32>
    %71 = arith.truncf %70 : vector<128x128xf32> to vector<128x128xbf16>
    %c0_42 = arith.constant 0 : index
    %c0_43 = arith.constant 0 : index
    %72 = vector.load %arg5[%c0_42, %c0_43] : memref<128x128xbf16, #tpu.memory_space<vmem>>, vector<128x128xbf16>
    %cst_44 = arith.constant dense<0.000000e+00> : vector<128x128xf32>
    %73 = tpu.matmul %71, %72, %cst_44 {dimension_numbers = #tpu.dot_dimension_numbers<[1], [0], [0], [1], [0, 0, 1, 1], [], []>} : vector<128x128xbf16>, vector<128x128xbf16>, vector<128x128xf32> -> vector<128x128xf32>
    %c0_45 = arith.constant 0 : index
    %c0_46 = arith.constant 0 : index
    %74 = vector.load %arg6[%c0_45, %c0_46] : memref<1x128xf32, #tpu.memory_space<vmem>>, vector<1x128xf32>
    %75 = vector.shape_cast %74 : vector<1x128xf32> to vector<128xf32>
    %76 = vector.shape_cast %75 : vector<128xf32> to vector<1x128xf32>
    %77 = vector.broadcast %76 : vector<1x128xf32> to vector<128x128xf32>
    %78 = arith.addf %73, %77 : vector<128x128xf32>
    %79 = vector.shape_cast %78 : vector<128x128xf32> to vector<8x16x128xf32>
    %c0_47 = arith.constant 0 : index
    %c0_48 = arith.constant 0 : index
    %c0_49 = arith.constant 0 : index
    %c0_50 = arith.constant 0 : index
    %80 = vector.load %arg7[%c0_47, %c0_48, %c0_49, %c0_50] : memref<1x8x16x128xf32, #tpu.memory_space<vmem>>, vector<1x8x16x128xf32>
    %81 = vector.shape_cast %80 : vector<1x8x16x128xf32> to vector<8x16x128xf32>
    %82 = vector.shape_cast %79 : vector<8x16x128xf32> to vector<1x8x16x128xf32>
    tpu.vector_store %arg7[%c0_47, %c0_48, %c0_49, %c0_50], %82 {strides = array<i32>} : memref<1x8x16x128xf32, #tpu.memory_space<vmem>>, vector<1x8x16x128xf32>,
    return
  }
  func.func @transform_0(%arg0: i32, %arg1: i32) -> (i32, i32, i32, i32) {
    %c0_i32 = arith.constant 0 : i32
    %c0_i32_0 = arith.constant 0 : i32
    %c0_i32_1 = arith.constant 0 : i32
    %c0_i32_2 = arith.constant 0 : i32
    return %arg0, %c0_i32, %c0_i32_0, %c0_i32_1 : i32, i32, i32, i32
  }
  func.func @transform_1(%arg0: i32, %arg1: i32) -> (i32, i32) {
    %c0_i32 = arith.constant 0 : i32
    %c0_i32_0 = arith.constant 0 : i32
    %c0_i32_1 = arith.constant 0 : i32
    return %c0_i32, %c0_i32_0 : i32, i32
  }
  func.func @transform_2(%arg0: i32, %arg1: i32) -> (i32, i32) {
    %c0_i32 = arith.constant 0 : i32
    %c0_i32_0 = arith.constant 0 : i32
    %c0_i32_1 = arith.constant 0 : i32
    return %c0_i32, %c0_i32_0 : i32, i32
  }
  func.func @transform_3(%arg0: i32, %arg1: i32) -> (i32, i32) {
    %c0_i32 = arith.constant 0 : i32
    %c0_i32_0 = arith.constant 0 : i32
    %c0_i32_1 = arith.constant 0 : i32
    return %c0_i32, %c0_i32_0 : i32, i32
  }
  func.func @transform_4(%arg0: i32, %arg1: i32) -> (i32, i32) {
    %c0_i32 = arith.constant 0 : i32
    %c0_i32_0 = arith.constant 0 : i32
    %c0_i32_1 = arith.constant 0 : i32
    return %c0_i32, %c0_i32_0 : i32, i32
  }
  func.func @transform_5(%arg0: i32, %arg1: i32) -> (i32, i32, i32, i32) {
    %c0_i32 = arith.constant 0 : i32
    %c0_i32_0 = arith.constant 0 : i32
    %c0_i32_1 = arith.constant 0 : i32
    return %arg0, %arg1, %c0_i32, %c0_i32_0 : i32, i32, i32, i32
  }
}

</mosaic_0001>

<bundles_post_ra>
// kernel: tpu_custom_call.1
= control target key start
LH: loop header
LB: loop body
LE: loop exit
PB: predicated region body
PF: predicated region fallthrough
CT: control target
= control target key end

     0   :  { %10 = vsyncpa [#allocation4], 0  ;;  %s2087_s0 = inlined_call_operand.vmem [shape: f32[2,18,18,128], index: 0, kind: input, shape index: {}]   ;;  %s2088_s1 = inlined_call_operand.vmem [shape: f32[9,128], index: 1, kind: input, shape index: {}]   ;;  %s2089_s2 = inlined_call_operand.vmem [shape: f32[1,128], index: 2, kind: input, shape index: {}]   ;;  %s2090_s3 = inlined_call_operand.vmem [shape: bf16[128,128], index: 3, kind: input, shape index: {}]   ;;  %s2091_s4 = inlined_call_operand.vmem [shape: f32[1,128], index: 4, kind: input, shape index: {}]   ;;  %s2092_s5 = inlined_call_operand.hbm [shape: f32[2,16,16,128], index: 5, kind: output, shape index: {}]  }
   0x1   :  { %12 = vsyncpa [#allocation4 + $0x1], 0  ;;  %s1390_s18 = smov 0   ;;  %s1392_s19 = smov 0  }
   0x2   :  { %s1394_s20 = smov 0   ;;  %s1396_s21 = smov 0  }
   0x3   :  { %s1398_s2 = smov 0   ;;  %s1400_s22 = smov 0  }
   0x4   :  { %s1402_s23 = smov 0   ;;  %s1404_s24 = smov 0  }
   0x5 LB: > { %s1082_s25 = sadd.s32 4294967295, %s1355_s24   ;;  %s1083_s26 = sadd.s32 4294967294, %s1355_s24   ;;  %s1355_s24 = sphi %s1404_s24, %s18_s24   ;;  %s1351_s23 = sphi %s1402_s23, %s2161_s23   ;;  %s1347_s22 = sphi %s1400_s22, %s2160_s22   ;;  %s1343_s2 = sphi %s1398_s2, %s2159_s2   ;;  %s1339_s21 = sphi %s1396_s21, %s2158_s21   ;;  %s1335_s20 = sphi %s1394_s20, %s2157_s20   ;;  %s1331_s19 = sphi %s1392_s19, %s2156_s19   ;;  %s1327_s18 = sphi %s1390_s18, %s2155_s18  }
   0x6   : > { %s27_s27 = sadd.s32 1, %s1347_s22  ;;  %s30_s28 = sadd.s32 1, %s1351_s23 }
   0x7   : > { %p28_p0 = scmp.ge.s32.totalorder %s27_s27, 2  ;;  %p159_p1 = scmp.ne.s32.totalorder %s1335_s20, %s1331_s19 }
   0x8   : > { %p160_p2 = scmp.eq.s32.totalorder %s1082_s25, 3  ;;  %p165_p5 = scmp.ne.s32.totalorder %s1331_s19, %s1327_s18 }
   0x9   : > { %s2163_s27 = smov (%p28_p0, %s27_s27), 0  ;;  %s2165_s28 = smov (!%p28_p0, %s30_s28), %s1351_s23 }
   0xa   : > { %s145_s29 = ssub.s32 %s1347_s22, %s2163_s27  ;;  %p1441_p3 = por %p160_p2, %p159_p1 }
   0xb   : > { %p32_p4 = scmp.ge.s32.totalorder %s2165_s28, 2  ;;  %p166_p6 = scmp.eq.s32.totalorder %s1083_s26, 3 }
   0xc   : > { %p1086_p7 = scmp.ge.s32.totalorder %s1355_s24, 1  ;;  %p204_p9 = scmp.lt.s32.totalorder %s1355_s24, 5 }
   0xd   : > { %s2167_s28 = smov (%p32_p4, %s2165_s28), 0  ;;  %p1450_p8 = por %p166_p6, %p165_p5 }
   0xe   : > { %s144_s7 = ssub.s32 %s1351_s23, %s2167_s28  ;;  %s149_s8 = sadd.s32 1, %s1335_s20 }
   0xf   : > { %s146_s9 = sor.u32 %s145_s29, %s144_s7  ;;  %p205_p10 = pnand %p1086_p7, %p204_p9 }
  0x10   : > { %p147_p11 = scmp.eq.s32.totalorder %s146_s9, 0 }
  0x11   : > { %208 = sbr.rel (%p205_p10) target bundleno = 338 (0x152), region = 40 }
  0x12   : > { %s1459_s10 = scalar_select %p147_p11, %s1335_s20, %s149_s8  }
  0x16   : > { %v1255_v0 = vld [vmem:[%s2090_s3 + $0x38] sm:$0xff]   ;;  %p232_p12 = scmp.lt.s32.totalorder %s1343_s2, 1  ;;  %v1256_v1 = vld [vmem:[%s2090_s3 + $0x30] sm:$0xff]   ;;  %s1090_s16 = smul.u32 192, %s1339_s21  ;;  %v1257_v2 = vld [vmem:[%s2090_s3 + $0x28] sm:$0xff]  }
  0x17   : > { %1133 = vmatprep.subr.bf16.mxu0 %v1255_v0  ;;  %1165 = vmatprep.subr.bf16.mxu1 %v1255_v0  ;;  %v1258_v3 = vld [vmem:[%s2090_s3 + $0x20] sm:$0xff]   ;;  %v1259_v22 = vld [vmem:[%s2090_s3 + $0x18] sm:$0xff]   ;;  %v1516_v29 = vld [vmem:[%s2090_s3 + $0x10] sm:$0xff]   ;;  %s1112_s29 = sshll.u32 %s1343_s2, 5 }
  0x18   : > { %s233_s15 = scalar_select %p232_p12, %s1343_s2, 1  ;;  %1134 = vmatpush3.bf16.msra.mxu0 %v1255_v0  ;;  %1173 = vmatpush3.bf16.msra.mxu1 %v1255_v0  ;;  %v1493_v21 = vld [vmem:[%s2088_s1] ss:$0 sm:$0xff]  ;;  %v1508_v27 = vld [vmem:[%s2088_s1 + $0x3] ss:$0 sm:$0xff]  ;;  %v1599_v60 = vld [vmem:[%s2090_s3 + $0x8] sm:$0xff]  }
  0x19   : > { %1135 = vmatprep.subr.bf16.mxu0 %v1256_v1  ;;  %1166 = vmatprep.subr.bf16.mxu1 %v1256_v1  ;;  %2119 = vst [vmem:[#allocation6_spill] sm:$0xff] %v1508_v27  ;;  %v1521_v30 = vld [vmem:[%s2088_s1 + $0x1] ss:$0 sm:$0xff]  ;;  %v1526_v31 = vld [vmem:[%s2088_s1 + $0x2] ss:$0 sm:$0xff] }
  0x1a   : > { %s1181_s26 = smul.u32 432, %s233_s15  ;;  %v1534_v33 = vld [vmem:[%s2088_s1 + $0x6] ss:$0 sm:$0xff]  ;;  %v1562_v44 = vld [vmem:[%s2088_s1 + $0x4] ss:$0 sm:$0xff] }
  0x1b   : > { %v1567_v45 = vld [vmem:[%s2088_s1 + $0x5] ss:$0 sm:$0xff]  ;;  %v1583_v53 = vld [vmem:[%s2088_s1 + $0x7] ss:$0 sm:$0xff]  ;;  %v1604_v63 = vld [vmem:[%s2088_s1 + $0x8] ss:$0 sm:$0xff] }
  0x1c   : > { %s236_s8 = scalar_lea.vmem %s2087_s0, %s1181_s26  ;;  %1136 = vmatpush3.bf16.msra.mxu0 %v1256_v1  ;;  %1174 = vmatpush3.bf16.msra.mxu1 %v1256_v1  ;;  %s1116_s26 = sshll.u32 %s1339_s21, 4 }
  0x1d   : > { %s1479_s12 = scalar_lea.vmem %s236_s8, %s1090_s16  ;;  %1137 = vmatprep.subr.bf16.mxu0 %v1257_v2  ;;  %1167 = vmatprep.subr.bf16.mxu1 %v1257_v2  ;;  %s1001_s7 = sadd.s32 %s1116_s26, %s1112_s29 }
  0x1e   : > { %v242_v4 = vld [vmem:[%s1479_s12] sm:$0xff]  ;;  %v243_v5 = vld [vmem:[%s1479_s12 + $0x8] sm:$0xff]  ;;  %v244_v6 = vld [vmem:[%s1479_s12 + $0x10] sm:$0x3]  ;;  %s1113_s8 = sshll.u32 %s1001_s7, 7 }
  0x1f   : > { %v245_v7 = vld [vmem:[%s1479_s12 + $0x18] sm:$0xff]  ;;  %v246_v8 = vld [vmem:[%s1479_s12 + $0x20] sm:$0xff]  ;;  %v247_v9 = vld [vmem:[%s1479_s12 + $0x28] sm:$0x3]  ;;  %v272_v10 = vmax.f32 %v242_v4, 0.0  ;;  %v273_v11 = vmax.f32 %v243_v5, 0.0  ;;  %s2028_s2 = scalar_lea.hbm %s2092_s5, %s1113_s8 }
  0x20   : > { %v248_v12 = vld [vmem:[%s1479_s12 + $0x30] sm:$0xff]  ;;  %v249_v13 = vld [vmem:[%s1479_s12 + $0x38] sm:$0xff]  ;;  %v250_v14 = vld [vmem:[%s1479_s12 + $0x40] sm:$0x3]  ;;  %v274_v15 = vmax.f32 %v244_v6, 0.0  ;;  %v275_v16 = vmax.f32 %v245_v7, 0.0  ;;  %1138 = vmatpush3.bf16.msra.mxu0 %v1257_v2  ;;  %1175 = vmatpush3.bf16.msra.mxu1 %v1257_v2 }
  0x21   : > { %v276_v17 = vmax.f32 %v246_v8, 0.0  ;;  %v277_v18 = vmax.f32 %v247_v9, 0.0  ;;  %v278_v19 = vmax.f32 %v248_v12, 0.0  ;;  %v279_v20 = vmax.f32 %v249_v13, 0.0  ;;  %302 = vst [vmem:[#allocation2] sm:$0xff] %v272_v10  ;;  %303 = vst [vmem:[#allocation2 + $0x8] sm:$0xff] %v273_v11  ;;  %1139 = vmatprep.subr.bf16.mxu0 %v1258_v3  ;;  %1168 = vmatprep.subr.bf16.mxu1 %v1258_v3 }
  0x22   : > { %v280_v23 = vmax.f32 %v250_v14, 0.0  ;;  %304 = vst [vmem:[#allocation2 + $0x10] sm:$0x3] %v274_v15  ;;  %305 = vst [vmem:[#allocation2 + $0x18] sm:$0xff] %v275_v16  ;;  %v254_v24 = vld [vmem:[%s1479_s12 + $0x60] sm:$0xff]  ;;  %v1500_v25 = vmul.f32 %v1493_v21, %v272_v10  ;;  %v1503_v26 = vmul.f32 %v1493_v21, %v273_v11  ;;  %v1511_v28 = vmul.f32 %v1493_v21, %v275_v16  ;;  %v255_v38 = vld [vmem:[%s1479_s12 + $0x68] sm:$0xff] }
  0x23   : > { %306 = vst [vmem:[#allocation2 + $0x20] sm:$0xff] %v276_v17  ;;  %307 = vst [vmem:[#allocation2 + $0x28] sm:$0x3] %v277_v18  ;;  %v1529_v32 = vmul.f32 %v1508_v27, %v275_v16  ;;  %v1537_v34 = vmul.f32 %v1493_v21, %v276_v17  ;;  %v1540_v35 = vmul.f32 %v1493_v21, %v278_v19  ;;  %v256_v39 = vld [vmem:[%s1479_s12 + $0x70] sm:$0x3]  ;;  %v257_v40 = vld [vmem:[%s1479_s12 + $0x78] sm:$0xff] }
  0x24   : > { %308 = vst [vmem:[#allocation2 + $0x30] sm:$0xff] %v278_v19  ;;  %309 = vst [vmem:[#allocation2 + $0x38] sm:$0xff] %v279_v20  ;;  %v1543_v36 = vmul.f32 %v1493_v21, %v279_v20  ;;  %1140 = vmatpush3.bf16.msra.mxu0 %v1258_v3  ;;  %1176 = vmatpush3.bf16.msra.mxu1 %v1258_v3  ;;  %v1546_v37 = vmul.f32 %v1508_v27, %v276_v17  ;;  %v1551_v41 = vmax.f32 %v254_v24, 0.0  ;;  %v258_v48 = vld [vmem:[%s1479_s12 + $0x80] sm:$0xff]  ;;  %v259_v49 = vld [vmem:[%s1479_s12 + $0x88] sm:$0x3] }
  0x25   : > { %310 = vst [vmem:[#allocation2 + $0x40] sm:$0x3] %v280_v23  ;;  %2120 = vst [vmem:[#allocation7_spill] sm:$0xff] %v1540_v35  ;;  %v1554_v42 = vmul.f32 %v1508_v27, %v278_v19  ;;  %v1557_v43 = vmul.f32 %v1508_v27, %v279_v20  ;;  %1141 = vmatprep.subr.bf16.mxu0 %v1259_v22  ;;  %1169 = vmatprep.subr.bf16.mxu1 %v1259_v22  ;;  %v260_v50 = vld [vmem:[%s1479_s12 + $0x90] sm:$0xff]  ;;  %v1578_v51 = vmax.f32 %v255_v38, 0.0  ;;  %v261_v54 = vld [vmem:[%s1479_s12 + $0x98] sm:$0xff] }
  0x26   : > { %2121 = vst [vmem:[#allocation8_spill] sm:$0xff] %v1543_v36  ;;  %2122 = vst [vmem:[#allocation9_spill] sm:$0xff] %v1551_v41  ;;  %v1570_v46 = vmul.f32 %v1534_v33, %v278_v19  ;;  %v1573_v47 = vmul.f32 %v1534_v33, %v279_v20  ;;  %v286_v52 = vmax.f32 %v256_v39, 0.0  ;;  %v262_v55 = vld [vmem:[%s1479_s12 + $0xa0] sm:$0x3]  ;;  %v1587_v56 = vmax.f32 %v257_v40, 0.0 }
  0x27   : > { %2123 = vst [vmem:[#allocation10_spill] sm:$0xff] %v1578_v51  ;;  %v1589_v57 = vmax.f32 %v258_v48, 0.0  ;;  %v289_v58 = vmax.f32 %v259_v49, 0.0  ;;  %314 = vst [vmem:[#allocation2 + $0x60] sm:$0xff] %v1551_v41  ;;  %v1594_v59 = vmul.f32 %v1493_v21, %v1551_v41  ;;  %v1606_v0 = vmax.f32 %v260_v50, 0.0  ;;  %v251_v4 = vld [vmem:[%s1479_s12 + $0x48] sm:$0xff] }
  0x28   : > { %2124 = vst [vmem:[#allocation11_spill] sm:$0xff] %v1587_v56  ;;  %v369_v61 = vld [vmem:[#allocation2 + $0x1] sm:$0xff]  ;;  %v1608_v1 = vmax.f32 %v261_v54, 0.0  ;;  %v292_v2 = vmax.f32 %v262_v55, 0.0  ;;  %315 = vst [vmem:[#allocation2 + $0x68] sm:$0xff] %v1578_v51  ;;  %v1613_v3 = vmul.f32 %v1493_v21, %v1578_v51  ;;  %1142 = vmatpush3.bf16.msra.mxu0 %v1259_v22  ;;  %1177 = vmatpush3.bf16.msra.mxu1 %v1259_v22  ;;  %v252_v10 = vld [vmem:[%s1479_s12 + $0x50] sm:$0xff] }
  0x29   : > { %2125 = vst [vmem:[#allocation12_spill] sm:$0xff] %v1589_v57  ;;  %v422_v62 = vld [vmem:[#allocation2 + $0x2] sm:$0xff]  ;;  %316 = vst [vmem:[#allocation2 + $0x70] sm:$0x3] %v286_v52  ;;  %v390_v6 = vmul.f32 %v1521_v30, %v369_v61  ;;  %v423_v7 = vld [vmem:[#allocation2 + $0xa] sm:$0xff]  ;;  %v1622_v9 = vmul.f32 %v1508_v27, %v1587_v56  ;;  %v1625_v11 = vmax.f32 %v251_v4, 0.0  ;;  %1143 = vmatprep.subr.bf16.mxu0 %v1516_v29  ;;  %1170 = vmatprep.subr.bf16.mxu1 %v1516_v29 }
  0x2a   : > { %2126 = vst [vmem:[#allocation13_spill] sm:$0xff] %v1608_v1  ;;  %v370_v5 = vld [vmem:[#allocation2 + $0x9] sm:$0xff]  ;;  %v443_v8 = vmul.f32 %v1526_v31, %v422_v62  ;;  %317 = vst [vmem:[#allocation2 + $0x78] sm:$0xff] %v1587_v56  ;;  %v444_v13 = vmul.f32 %v1526_v31, %v423_v7  ;;  %v529_v14 = vld [vmem:[#allocation2 + $0x19] sm:$0xff]  ;;  %v1635_v17 = vmul.f32 %v1508_v27, %v1589_v57  ;;  %v1637_v18 = vmax.f32 %v252_v10, 0.0 }
  0x2b   : > { %318 = vst [vmem:[#allocation2 + $0x80] sm:$0xff] %v1589_v57  ;;  %319 = vst [vmem:[#allocation2 + $0x88] sm:$0x3] %v289_v58  ;;  %v391_v12 = vmul.f32 %v1521_v30, %v370_v5  ;;  %v530_v15 = vld [vmem:[#allocation2 + $0x21] sm:$0xff]  ;;  %v406_v19 = vadd.f32 %v390_v6, %v1500_v25  ;;  %v550_v20 = vmul.f32 %v1562_v44, %v529_v14  ;;  %v1645_v38 = vld [vmem:[#allocation2 + $0x31] sm:$0xff] }
  0x2c   : > { %v582_v16 = vld [vmem:[#allocation2 + $0x1a] sm:$0xff]  ;;  %320 = vst [vmem:[#allocation2 + $0x90] sm:$0xff] %v1606_v0  ;;  %321 = vst [vmem:[#allocation2 + $0x98] sm:$0xff] %v1608_v1  ;;  %v551_v22 = vmul.f32 %v1562_v44, %v530_v15  ;;  %v1642_v23 = vld [vmem:[#allocation2 + $0x22] sm:$0xff]  ;;  %v1655_v48 = vmul.f32 %v1583_v53, %v1645_v38  ;;  %1144 = vmatpush3.bf16.msra.mxu0 %v1516_v29  ;;  %1178 = vmatpush3.bf16.msra.mxu1 %v1516_v29 }
  0x2d   : > { %322 = vst [vmem:[#allocation2 + $0xa0] sm:$0x3] %v292_v2  ;;  %v603_v24 = vmul.f32 %v1567_v45, %v582_v16  ;;  %v1647_v39 = vld [vmem:[#allocation2 + $0x39] sm:$0xff]  ;;  %311 = vst [vmem:[#allocation2 + $0x48] sm:$0xff] %v1625_v11  ;;  %v407_v40 = vadd.f32 %v391_v12, %v1503_v26  ;;  %v604_v25 = vmul.f32 %v1567_v45, %v1642_v23  ;;  %v263_v62 = vld [vmem:[%s1479_s12 + $0xa8] sm:$0xff]  ;;  %1145 = vmatprep.subr.bf16.mxu0 %v1599_v60 }
  0x2e   : > { %v1659_v49 = vmul.f32 %v1583_v53, %v1647_v39  ;;  %v1661_v50 = vld [vmem:[#allocation2 + $0x32] sm:$0xff]  ;;  %v1663_v52 = vld [vmem:[#allocation2 + $0x3a] sm:$0xff]  ;;  %312 = vst [vmem:[#allocation2 + $0x50] sm:$0xff] %v1637_v18  ;;  %v459_v26 = vadd.f32 %v443_v8, %v406_v19  ;;  %1171 = vmatprep.subr.bf16.mxu1 %v1599_v60  ;;  %v1685_v4 = vmul.f32 %v1534_v33, %v1606_v0  ;;  %v1693_v8 = vmax.f32 %v263_v62, 0.0 }
  0x2f   : > { %v253_v54 = vld [vmem:[%s1479_s12 + $0x58] sm:$0x3]  ;;  %v1671_v55 = vmul.f32 %v1604_v63, %v1661_v50  ;;  %v1675_v58 = vmul.f32 %v1604_v63, %v1663_v52  ;;  %v1262_v2 = vld [vmem:[%s2090_s3] sm:$0xff]   ;;  %v460_v29 = vadd.f32 %v444_v13, %v407_v40  ;;  %v1689_v5 = vmul.f32 %v1534_v33, %v1608_v1  ;;  %v264_v6 = vld [vmem:[%s1479_s12 + $0xb0] sm:$0xff] }
  0x30   : > { %v283_v61 = vmax.f32 %v253_v54, 0.0  ;;  %v265_v7 = vld [vmem:[%s1479_s12 + $0xb8] sm:$0x3]  ;;  %2127 = vst [vmem:[#allocation14_spill] sm:$0xff] %v1693_v8  ;;  %v513_v10 = vadd.f32 %v1529_v32, %v459_v26  ;;  %v1696_v12 = vld [vmem:[#allocation2 + $0x61] sm:$0xff]  ;;  %v1698_v19 = vld [vmem:[#allocation2 + $0x69] sm:$0xff]  ;;  %v392_v13 = vmul.f32 %v1521_v30, %v529_v14  ;;  %v393_v40 = vmul.f32 %v1521_v30, %v530_v15  ;;  %1146 = vmatpush3.bf16.msra.mxu0 %v1599_v60 }
  0x31   : > { %2128 = vst [vmem:[#allocation15_spill] sm:$0xff] %v1696_v12  ;;  %2129 = vst [vmem:[#allocation16_spill] sm:$0xff] %v1698_v19  ;;  %v1700_v54 = vld [vmem:[#allocation2 + $0x62] sm:$0xff]  ;;  %v445_v51 = vmul.f32 %v1526_v31, %v582_v16  ;;  %v514_v41 = vadd.f32 %v1546_v37, %v460_v29  ;;  %v398_v62 = vmul.f32 %v1521_v30, %v1696_v12  ;;  %v1710_v26 = vld [vmem:[#allocation2 + $0x6a] sm:$0xff]  ;;  %1179 = vmatpush3.bf16.msra.mxu1 %v1599_v60 }
  0x32   : > { %2130 = vst [vmem:[#allocation17_spill] sm:$0xff] %v1700_v54  ;;  %313 = vst [vmem:[#allocation2 + $0x58] sm:$0x3] %v283_v61  ;;  %v399_v32 = vmul.f32 %v1521_v30, %v1698_v19  ;;  %v451_v61 = vmul.f32 %v1526_v31, %v1700_v54  ;;  %v1714_v36 = vld [vmem:[#allocation2 + $0x79] sm:$0xff]  ;;  %v566_v37 = vadd.f32 %v550_v20, %v513_v10  ;;  %v1723_v16 = vmax.f32 %v264_v6, 0.0  ;;  %v1728_v35 = vld [vmem:[#allocation2 + $0x81] sm:$0xff] }
  0x33   : > { %2131 = vst [vmem:[#allocation18_spill] sm:$0xff] %v1710_v26  ;;  %2132 = vst [vmem:[#allocation19_spill] sm:$0xff] %v1714_v36  ;;  %v452_v14 = vmul.f32 %v1526_v31, %v1710_v26  ;;  %v558_v15 = vmul.f32 %v1562_v44, %v1714_v36  ;;  %v266_v29 = vld [vmem:[%s1479_s12 + $0xc0] sm:$0xff]  ;;  %1147 = vmatprep.subr.bf16.mxu0 %v1262_v2  ;;  %1172 = vmatprep.subr.bf16.mxu1 %v1262_v2  ;;  %v295_v10 = vmax.f32 %v265_v7, 0.0  ;;  %v1747_v7 = vld [vmem:[#allocation2 + $0x92] sm:$0xff] }
  0x34   : > { %323 = vst [vmem:[#allocation2 + $0xa8] sm:$0xff] %v1693_v8  ;;  %v567_v54 = vadd.f32 %v551_v22, %v514_v41  ;;  %v414_v19 = vadd.f32 %v398_v62, %v1594_v59  ;;  %v415_v12 = vadd.f32 %v399_v32, %v1613_v3  ;;  %2133 = vst [vmem:[#allocation20_spill] sm:$0xff] %v1728_v35  ;;  %v1730_v60 = vld [vmem:[#allocation2 + $0x7a] sm:$0xff]  ;;  %v1732_v20 = vld [vmem:[#allocation2 + $0x82] sm:$0xff]  ;;  %1148 = vmatpush3.bf16.msra.mxu0 %v1262_v2 }
  0x35   : > { %2134 = vst [vmem:[#allocation21_spill] sm:$0xff] %v1730_v60  ;;  %2135 = vst [vmem:[#allocation22_spill] sm:$0xff] %v1732_v20  ;;  %v619_v26 = vadd.f32 %v603_v24, %v566_v37  ;;  %v559_v6 = vmul.f32 %v1562_v44, %v1728_v35  ;;  %v611_v8 = vmul.f32 %v1567_v45, %v1730_v60  ;;  %v1740_v59 = vld [vmem:[#allocation2 + $0x91] sm:$0xff]  ;;  %v1743_v32 = vld [vmem:[#allocation2 + $0x99] sm:$0xff]  ;;  %1180 = vmatpush3.bf16.msra.mxu1 %v1262_v2 }
  0x36   : > { %v612_v41 = vmul.f32 %v1567_v45, %v1732_v20  ;;  %324 = vst [vmem:[#allocation2 + $0xb0] sm:$0xff] %v1723_v16  ;;  %v620_v3 = vadd.f32 %v604_v25, %v567_v54  ;;  %v467_v22 = vadd.f32 %v451_v61, %v414_v19  ;;  %v468_v62 = vadd.f32 %v452_v14, %v415_v12  ;;  %v1752_v27 = vld [vmem:[#allocation2 + $0x9a] sm:$0xff] }
  0x37   : > { %v718_v24 = vmul.f32 %v1583_v53, %v1740_v59  ;;  %325 = vst [vmem:[#allocation2 + $0xb8] sm:$0x3] %v295_v10  ;;  %v673_v37 = vadd.f32 %v1570_v46, %v619_v26  ;;  %v719_v1 = vmul.f32 %v1583_v53, %v1743_v32  ;;  %v771_v25 = vmul.f32 %v1604_v63, %v1747_v7 }
  0x38   : > { %v1756_v12 = vmax.f32 %v266_v29, 0.0  ;;  %v674_v19 = vadd.f32 %v1573_v47, %v620_v3  ;;  %v521_v54 = vadd.f32 %v1622_v9, %v467_v22  ;;  %v522_v61 = vadd.f32 %v1635_v17, %v468_v62 }
  0x39   : > { %v772_v2 = vmul.f32 %v1604_v63, %v1752_v27  ;;  %v726_v46 = vadd.f32 %v1655_v48, %v673_v37  ;;  %v408_v26 = vadd.f32 %v392_v13, %v1511_v28  ;;  %v409_v14 = vadd.f32 %v393_v40, %v1537_v34  ;;  %v1790_v37 = vld [vmem:[#allocation2 + $0x51] sm:$0xff] }
  0x3a   : > { %v446_v10 = vmul.f32 %v1526_v31, %v1642_v23  ;;  %326 = vst [vmem:[#allocation2 + $0xc0] sm:$0xff] %v1756_v12  ;;  %v727_v47 = vadd.f32 %v1659_v49, %v674_v19  ;;  %v574_v29 = vadd.f32 %v558_v15, %v521_v54  ;;  %v575_v9 = vadd.f32 %v559_v6, %v522_v61  ;;  %v1796_v61 = vld [vmem:[#allocation2 + $0x4a] sm:$0xff] }
  0x3b   : > { %v552_v17 = vmul.f32 %v1562_v44, %v1645_v38  ;;  %v779_v3 = vadd.f32 %v1671_v55, %v726_v46  ;;  %v461_v22 = vadd.f32 %v445_v51, %v408_v26  ;;  %v553_v28 = vmul.f32 %v1562_v44, %v1647_v39 }
  0x3c   : > { %v462_v48 = vadd.f32 %v446_v10, %v409_v14  ;;  %v780_v34 = vadd.f32 %v1675_v58, %v727_v47  ;;  %v627_v13 = vadd.f32 %v611_v8, %v574_v29  ;;  %v628_v23 = vadd.f32 %v612_v41, %v575_v9  ;;  %v1788_v41 = vld [vmem:[#allocation2 + $0x49] sm:$0xff] }
  0x3d   : > { %v605_v40 = vmul.f32 %v1567_v45, %v1661_v50  ;;  %v515_v49 = vadd.f32 %v1554_v42, %v461_v22  ;;  %v606_v6 = vmul.f32 %v1567_v45, %v1663_v52  ;;  %v659_v51 = vmul.f32 %v1534_v33, %v1625_v11 }
  0x3e   : > { %v516_v15 = vadd.f32 %v1557_v43, %v462_v48  ;;  %v795_v55 = vpack.c.bf16 %v780_v34, %v779_v3  ;;  %v681_v62 = vadd.f32 %v1685_v4, %v627_v13  ;;  %v682_v58 = vadd.f32 %v1689_v5, %v628_v23  ;;  %v1798_v4 = vld [vmem:[#allocation2 + $0x52] sm:$0xff] }
  0x3f   : > { %v660_v8 = vmul.f32 %v1534_v33, %v1637_v18  ;;  %v568_v42 = vadd.f32 %v552_v17, %v515_v49  ;;  %v712_v19 = vmul.f32 %v1583_v53, %v1788_v41  ;;  %v713_v54 = vmul.f32 %v1583_v53, %v1790_v37 }
  0x40   : > { %v569_v43 = vadd.f32 %v553_v28, %v516_v15  ;;  %1149 = vmatprep.mubr.bf16.mxu0 %v795_v55  ;;  %v734_v5 = vadd.f32 %v718_v24, %v681_v62  ;;  %v735_v46 = vadd.f32 %v719_v1, %v682_v58  ;;  %v765_v26 = vmul.f32 %v1604_v63, %v1796_v61 }
  0x41   : > { %v766_v14 = vmul.f32 %v1604_v63, %v1798_v4  ;;  %v621_v10 = vadd.f32 %v605_v40, %v568_v42  ;;  %v363_v29 = vmul.f32 %v1493_v21, %v1587_v56  ;;  %v364_v9 = vmul.f32 %v1493_v21, %v1589_v57 }
  0x42   : > { %v622_v47 = vadd.f32 %v606_v6, %v569_v43  ;;  %v787_v17 = vadd.f32 %v771_v25, %v734_v5  ;;  %v788_v3 = vadd.f32 %v772_v2, %v735_v46  ;;  %v400_v24 = vmul.f32 %v1521_v30, %v1714_v36  ;;  %v2136_v25 = vld [vmem:[#allocation6_spill] sm:$0xff]  ;;  %v2137_v6 = vld [vmem:[#allocation13_spill] sm:$0xff] }
  0x43   : > { %v401_v1 = vmul.f32 %v1521_v30, %v1728_v35  ;;  %v675_v22 = vadd.f32 %v659_v51, %v621_v10  ;;  %v453_v28 = vmul.f32 %v1526_v31, %v1730_v60  ;;  %v454_v34 = vmul.f32 %v1526_v31, %v1732_v20  ;;  %v1830_v10 = vld [vmem:[#allocation2 + $0xa9] sm:$0xff]  ;;  %v2144_v20 = vld [vmem:[#allocation16_spill] sm:$0xff] }
  0x44   : > { %v676_v48 = vadd.f32 %v660_v8, %v622_v47  ;;  %v799_v13 = vpack.c.bf16 %v788_v3, %v787_v17  ;;  %v416_v23 = vadd.f32 %v400_v24, %v363_v29  ;;  %v507_v2 = vmul.f32 %v2136_v25, %v1606_v0  ;;  %v1834_v17 = vld [vmem:[#allocation2 + $0xb1] sm:$0xff] }
  0x45   : > { %v417_v40 = vadd.f32 %v401_v1, %v364_v9  ;;  %v728_v49 = vadd.f32 %v712_v19, %v675_v22  ;;  %v508_v55 = vmul.f32 %v2136_v25, %v2137_v6  ;;  %v560_v51 = vmul.f32 %v1562_v44, %v1740_v59 }
  0x46   : > { %v729_v15 = vadd.f32 %v713_v54, %v676_v48  ;;  %1157 = vmatprep.mubr.bf16.mxu1 %v799_v13  ;;  %v469_v62 = vadd.f32 %v453_v28, %v416_v23  ;;  %v561_v8 = vmul.f32 %v1562_v44, %v1743_v32  ;;  %v613_v42 = vmul.f32 %v1567_v45, %v1747_v7  ;;  %v2138_v54 = vld [vmem:[#allocation14_spill] sm:$0xff] }
  0x47   : > { %v470_v58 = vadd.f32 %v454_v34, %v417_v40  ;;  %v781_v43 = vadd.f32 %v765_v26, %v728_v49  ;;  %v614_v19 = vmul.f32 %v1567_v45, %v1752_v27  ;;  %v667_v46 = vmul.f32 %v1534_v33, %v2138_v54  ;;  %v1838_v26 = vld [vmem:[#allocation2 + $0xaa] sm:$0xff] }
  0x48   : > { %v782_v5 = vadd.f32 %v766_v14, %v729_v15  ;;  %v523_v47 = vadd.f32 %v507_v2, %v469_v62  ;;  %v668_v9 = vmul.f32 %v1534_v33, %v1723_v16  ;;  %v720_v3 = vmul.f32 %v1583_v53, %v1830_v10  ;;  %v1840_v14 = vld [vmem:[#allocation2 + $0xb2] sm:$0xff] }
  0x49   : > { %v524_v29 = vadd.f32 %v508_v55, %v470_v58  ;;  %v721_v1 = vmul.f32 %v1583_v53, %v1834_v17  ;;  %v773_v22 = vmul.f32 %v1604_v63, %v1838_v26  ;;  %v774_v48 = vmul.f32 %v1604_v63, %v1840_v14 }
  0x4a   : > { %v796_v24 = vpack.c.bf16 %v782_v5, %v781_v43  ;;  %v576_v28 = vadd.f32 %v560_v51, %v523_v47  ;;  %v394_v13 = vmul.f32 %v1521_v30, %v1645_v38  ;;  %v395_v23 = vmul.f32 %v1521_v30, %v1647_v39  ;;  %v2139_v51 = vld [vmem:[#allocation7_spill] sm:$0xff]  ;;  %v2140_v39 = vld [vmem:[#allocation8_spill] sm:$0xff] }
  0x4b   : > { %v577_v34 = vadd.f32 %v561_v8, %v524_v29  ;;  %v447_v40 = vmul.f32 %v1526_v31, %v1661_v50  ;;  %v448_v2 = vmul.f32 %v1526_v31, %v1663_v52  ;;  %v501_v49 = vmul.f32 %v2136_v25, %v1625_v11  ;;  %v267_v29 = vld [vmem:[%s1479_s12 + $0xc8] sm:$0xff] }
  0x4c   : > { %1150 = vmatmul.mubr.bf16.vlgmr.msra.gmra.mxu0 %v796_v24  ;;  %v502_v15 = vmul.f32 %v2136_v25, %v1637_v18  ;;  %v629_v55 = vadd.f32 %v613_v42, %v576_v28  ;;  %v410_v62 = vadd.f32 %v394_v13, %v2139_v51  ;;  %v411_v58 = vadd.f32 %v395_v23, %v2140_v39  ;;  %v268_v24 = vld [vmem:[%s1479_s12 + $0xd0] sm:$0x3]  ;;  %v2141_v28 = vld [vmem:[#allocation9_spill] sm:$0xff]  ;;  %v2143_v51 = vld [vmem:[#allocation15_spill] sm:$0xff] }
  0x4d   : > { %v630_v38 = vadd.f32 %v614_v19, %v577_v34  ;;  %v554_v50 = vmul.f32 %v1562_v44, %v1788_v41  ;;  %v555_v8 = vmul.f32 %v1562_v44, %v1790_v37  ;;  %v607_v52 = vmul.f32 %v1567_v45, %v1796_v61  ;;  %v2142_v13 = vld [vmem:[#allocation10_spill] sm:$0xff] }
  0x4e   : > { %v608_v43 = vmul.f32 %v1567_v45, %v1798_v4  ;;  %v683_v5 = vadd.f32 %v667_v46, %v629_v55  ;;  %v463_v42 = vadd.f32 %v447_v40, %v410_v62  ;;  %v464_v19 = vadd.f32 %v448_v2, %v411_v58  ;;  %v2145_v40 = vld [vmem:[#allocation17_spill] sm:$0xff]  ;;  %v2146_v55 = vld [vmem:[#allocation18_spill] sm:$0xff] }
  0x4f   : > { %v684_v47 = vadd.f32 %v668_v9, %v630_v38  ;;  %v661_v34 = vmul.f32 %v1534_v33, %v2141_v28  ;;  %v662_v23 = vmul.f32 %v1534_v33, %v2142_v13  ;;  %v714_v39 = vmul.f32 %v1583_v53, %v2143_v51 }
  0x50   : > { %v715_v60 = vmul.f32 %v1583_v53, %v2144_v20  ;;  %v736_v35 = vadd.f32 %v720_v3, %v683_v5  ;;  %v517_v46 = vadd.f32 %v501_v49, %v463_v42  ;;  %v518_v9 = vadd.f32 %v502_v15, %v464_v19 }
  0x51   : > { %v737_v36 = vadd.f32 %v721_v1, %v684_v47  ;;  %v767_v2 = vmul.f32 %v1604_v63, %v2145_v40  ;;  %v768_v38 = vmul.f32 %v1604_v63, %v2146_v55  ;;  %v1884_v62 = vmax.f32 %v267_v29, 0.0 }
  0x52   : > { %v298_v58 = vmax.f32 %v268_v24, 0.0  ;;  %v789_v57 = vadd.f32 %v773_v22, %v736_v35  ;;  %v570_v13 = vadd.f32 %v554_v50, %v517_v46  ;;  %v571_v51 = vadd.f32 %v555_v8, %v518_v9 }
  0x53   : > { %v790_v56 = vadd.f32 %v774_v48, %v737_v36  ;;  %327 = vst [vmem:[#allocation2 + $0xc8] sm:$0xff] %v1884_v62  ;;  %v365_v3 = vmul.f32 %v1493_v21, %v1606_v0  ;;  %v366_v1 = vmul.f32 %v1493_v21, %v2137_v6  ;;  %v402_v49 = vmul.f32 %v1521_v30, %v1740_v59 }
  0x54   : > { %328 = vst [vmem:[#allocation2 + $0xd0] sm:$0x3] %v298_v58  ;;  %v403_v15 = vmul.f32 %v1521_v30, %v1743_v32  ;;  %v623_v35 = vadd.f32 %v607_v52, %v570_v13  ;;  %v624_v36 = vadd.f32 %v608_v43, %v571_v51  ;;  %v455_v22 = vmul.f32 %v1526_v31, %v1747_v7 }
  0x55   : > { %v800_v5 = vpack.c.bf16 %v790_v56, %v789_v57  ;;  %v418_v48 = vadd.f32 %v402_v49, %v365_v3  ;;  %v456_v0 = vmul.f32 %v1526_v31, %v1752_v27  ;;  %v509_v6 = vmul.f32 %v2136_v25, %v2138_v54 }
  0x56   : > { %v419_v50 = vadd.f32 %v403_v15, %v366_v1  ;;  %v677_v8 = vadd.f32 %v661_v34, %v623_v35  ;;  %v678_v59 = vadd.f32 %v662_v23, %v624_v36  ;;  %v510_v32 = vmul.f32 %v2136_v25, %v1723_v16 }
  0x57   : > { %1158 = vmatmul.mubr.bf16.vlgmr.msra.gmra.mxu1 %v800_v5  ;;  %v562_v56 = vmul.f32 %v1562_v44, %v1830_v10  ;;  %v471_v57 = vadd.f32 %v455_v22, %v418_v48  ;;  %v563_v7 = vmul.f32 %v1562_v44, %v1834_v17  ;;  %v615_v27 = vmul.f32 %v1567_v45, %v1838_v26 }
  0x58   : > { %v472_v52 = vadd.f32 %v456_v0, %v419_v50  ;;  %v730_v43 = vadd.f32 %v714_v39, %v677_v8  ;;  %v731_v47 = vadd.f32 %v715_v60, %v678_v59  ;;  %v616_v42 = vmul.f32 %v1567_v45, %v1840_v14 }
  0x59   : > { %v669_v19 = vmul.f32 %v1534_v33, %v1756_v12  ;;  %v525_v29 = vadd.f32 %v509_v6, %v471_v57  ;;  %v670_v34 = vmul.f32 %v1534_v33, %v1884_v62  ;;  %v359_v13 = vmul.f32 %v1493_v21, %v1625_v11  ;;  %v2147_v6 = vld [vmem:[#allocation10_spill] sm:$0xff] }
  0x5a   : > { %v526_v24 = vadd.f32 %v510_v32, %v472_v52  ;;  %v783_v23 = vadd.f32 %v767_v2, %v730_v43  ;;  %v784_v51 = vadd.f32 %v768_v38, %v731_v47  ;;  %v1917_v46 = vld [vmem:[#allocation2 + $0xc1] sm:$0xff]  ;;  %v360_v60 = vmul.f32 %v1493_v21, %v1637_v18  ;;  %v2149_v47 = vld [vmem:[#allocation11_spill] sm:$0xff] }
  0x5b   : > { %v1919_v39 = vld [vmem:[#allocation2 + $0xc9] sm:$0xff]  ;;  %v396_v9 = vmul.f32 %v1521_v30, %v1788_v41  ;;  %v578_v58 = vadd.f32 %v562_v56, %v525_v29  ;;  %v722_v1 = vmul.f32 %v1583_v53, %v1917_v46  ;;  %v397_v41 = vmul.f32 %v1521_v30, %v1790_v37  ;;  %v2148_v56 = vld [vmem:[#allocation15_spill] sm:$0xff]  ;;  %v270_v29 = vld [vmem:[%s1479_s12 + $0xe0] sm:$0xff] }
  0x5c   : > { %v579_v3 = vadd.f32 %v563_v7, %v526_v24  ;;  %v723_v11 = vmul.f32 %v1583_v53, %v1919_v39  ;;  %v1929_v2 = vld [vmem:[#allocation2 + $0xc2] sm:$0xff]  ;;  %v1931_v38 = vld [vmem:[#allocation2 + $0xca] sm:$0xff]  ;;  %v797_v49 = vpack.c.bf16 %v784_v51, %v783_v23  ;;  %v449_v22 = vmul.f32 %v1526_v31, %v1796_v61  ;;  %v2151_v23 = vld [vmem:[#allocation19_spill] sm:$0xff] }
  0x5d   : > { %v775_v15 = vmul.f32 %v1604_v63, %v1929_v2  ;;  %v776_v18 = vmul.f32 %v1604_v63, %v1931_v38  ;;  %v631_v5 = vadd.f32 %v615_v27, %v578_v58  ;;  %v412_v36 = vadd.f32 %v396_v9, %v359_v13  ;;  %v2152_v51 = vld [vmem:[#allocation20_spill] sm:$0xff] }
  0x5e   : > { %v632_v35 = vadd.f32 %v616_v42, %v579_v3  ;;  %1153 = vmatprep.mubr.bf16.mxu0 %v797_v49  ;;  %v413_v48 = vadd.f32 %v397_v41, %v360_v60  ;;  %v450_v50 = vmul.f32 %v1526_v31, %v1798_v4  ;;  %v503_v0 = vmul.f32 %v2136_v25, %v2141_v28  ;;  %v271_v60 = vld [vmem:[%s1479_s12 + $0xe8] sm:$0x3]  ;;  %v2154_v49 = vld [vmem:[#allocation22_spill] sm:$0xff] }
  0x5f   : > { %v504_v8 = vmul.f32 %v2136_v25, %v2147_v6  ;;  %v685_v37 = vadd.f32 %v669_v19, %v631_v5  ;;  %v465_v32 = vadd.f32 %v449_v22, %v412_v36  ;;  %v556_v61 = vmul.f32 %v1562_v44, %v2148_v56  ;;  %v269_v19 = vld [vmem:[%s1479_s12 + $0xd8] sm:$0xff]  ;;  %v2153_v3 = vld [vmem:[#allocation21_spill] sm:$0xff]  ;;  %s229_s12 = sand.u32 1, %s1331_s19  }
  0x60   : > { %v686_v59 = vadd.f32 %v670_v34, %v632_v35  ;;  %v466_v57 = vadd.f32 %v450_v50, %v413_v48  ;;  %v557_v52 = vmul.f32 %v1562_v44, %v2144_v20  ;;  %v609_v4 = vmul.f32 %v1567_v45, %v2145_v40  ;;  %v2150_v34 = vld [vmem:[#allocation12_spill] sm:$0xff]  ;;  %s1087_s15 = sshll.u32 %s229_s12, 7  ;;  %s2036_s13 = scalar_lea.sflag [#allocation4], %s229_s12 }
  0x61   : > { %v610_v28 = vmul.f32 %v1567_v45, %v2146_v55  ;;  %v738_v7 = vadd.f32 %v722_v1, %v685_v37  ;;  %v519_v43 = vadd.f32 %v503_v0, %v465_v32  ;;  %v663_v42 = vmul.f32 %v1534_v33, %v2149_v47  ;;  %s2006_s25 = scalar_lea.vmem [#allocation3], %s1087_s15  ;;  %s1357_s15 = smov [#allocation3]  }
  0x62   : > { %v739_v27 = vadd.f32 %v723_v11, %v686_v59  ;;  %v520_v24 = vadd.f32 %v504_v8, %v466_v57  ;;  %v664_v13 = vmul.f32 %v1534_v33, %v2150_v34  ;;  %v716_v20 = vmul.f32 %v1583_v53, %v2151_v23  ;;  %s1004_s9 = sshll.u32 %s2006_s25, 4  ;;  %s1267_s16 = sshll.u32 %s1357_s15, 4  ;;  %s2030_s9 = int_to_ptr.vmem [resolvable:$true] %s1004_s9  ;;  %s1268_s16 = int_to_ptr.vmem [resolvable:$false] %s1267_s16 }
  0x63   : > { %v717_v40 = vmul.f32 %v1583_v53, %v2152_v51  ;;  %v791_v55 = vadd.f32 %v775_v15, %v738_v7  ;;  %v572_v58 = vadd.f32 %v556_v61, %v519_v43  ;;  %v769_v1 = vmul.f32 %v1604_v63, %v2153_v3  ;;  %s1263_s14 = scalar_lea.vmem %s2030_s9, 2048  ;;  %s1269_s17 = scalar_lea.vmem %s1268_s16, 4096 }
  0x64   : > { %v792_v9 = vadd.f32 %v776_v18, %v739_v27  ;;  %v573_v11 = vadd.f32 %v557_v52, %v520_v24  ;;  %v770_v41 = vmul.f32 %v1604_v63, %v2154_v49  ;;  %v299_v5 = vmax.f32 %v269_v19, 0.0  ;;  %p1264_p13 = scmp.ne.s32.totalorder %s2030_s9, %s1263_s14  ;;  %p1270_p2 = scmp.lt.s32.totalorder %s2030_s9, %s1268_s16 }
  0x65   : > { %v300_v35 = vmax.f32 %v270_v29, 0.0  ;;  %v625_v22 = vadd.f32 %v609_v4, %v572_v58  ;;  %v301_v48 = vmax.f32 %v271_v60, 0.0  ;;  %v367_v50 = vmul.f32 %v1493_v21, %v2138_v54  ;;  %p1271_p4 = scmp.lt.s32.totalorder %s1269_s17, %s1263_s14 }
  0x66   : > { %v801_v36 = vpack.c.bf16 %v792_v9, %v791_v55  ;;  %v626_v0 = vadd.f32 %v610_v28, %v573_v11  ;;  %329 = vst [vmem:[#allocation2 + $0xd8] sm:$0xff] %v299_v5  ;;  %v368_v15 = vmul.f32 %v1493_v21, %v1723_v16  ;;  %v404_v18 = vmul.f32 %v1521_v30, %v1830_v10  ;;  %p1265_p0 = pnand %p1264_p13, %p1441_p3 }
  0x67   : > { %330 = vst [vmem:[#allocation2 + $0xe0] sm:$0xff] %v300_v35  ;;  %v405_v6 = vmul.f32 %v1521_v30, %v1834_v17  ;;  %v679_v8 = vadd.f32 %v663_v42, %v625_v22  ;;  %331 = vst [vmem:[#allocation2 + $0xe8] sm:$0x3] %v301_v48  ;;  %v457_v37 = vmul.f32 %v1526_v31, %v1838_v26  ;;  %p1272_p5 = por %p1271_p4, %p1270_p2 }
  0x68   : > { %1161 = vmatprep.mubr.bf16.mxu1 %v801_v36  ;;  %v458_v54 = vmul.f32 %v1526_v31, %v1840_v14  ;;  %v511_v59 = vmul.f32 %v2136_v25, %v1756_v12  ;;  %v680_v32 = vadd.f32 %v664_v13, %v626_v0  ;;  %v420_v21 = vadd.f32 %v404_v18, %v367_v50  ;;  %p1266_p1 = pneg %p1265_p0 }
  0x69   : > { %v421_v16 = vadd.f32 %v405_v6, %v368_v15  ;;  %v512_v10 = vmul.f32 %v2136_v25, %v1884_v62  ;;  %v732_v56 = vadd.f32 %v716_v20, %v679_v8  ;;  %v564_v30 = vmul.f32 %v1562_v44, %v1917_v46 }
  0x6a   : > { %v733_v17 = vadd.f32 %v717_v40, %v680_v32  ;;  %v473_v61 = vadd.f32 %v457_v37, %v420_v21  ;;  %v565_v26 = vmul.f32 %v1562_v44, %v1919_v39  ;;  %v617_v12 = vmul.f32 %v1567_v45, %v1929_v2  ;;  %v1100_v40 = vld [vmem:[%s2091_s4] ss:$0 sm:$0xff]  ;;  %p1273_p6 = pnand %p1272_p5, %p1266_p1 }
  0x6b   : > { %v474_v57 = vadd.f32 %v458_v54, %v421_v16  ;;  %v785_v31 = vadd.f32 %v769_v1, %v732_v56  ;;  %v618_v25 = vmul.f32 %v1567_v45, %v1931_v38  ;;  %v671_v62 = vmul.f32 %v1534_v33, %v299_v5 }
  0x6c   : > { %v786_v14 = vadd.f32 %v770_v41, %v733_v17  ;;  %v527_v52 = vadd.f32 %v511_v59, %v473_v61  ;;  %v672_v43 = vmul.f32 %v1534_v33, %v300_v35 }
  0x6d   : > { %v528_v4 = vadd.f32 %v512_v10, %v474_v57 }
  0x6e   : > { %v703_v28 = vld [vmem:[#allocation2 + $0xd9] sm:$0xff]  ;;  %v798_v46 = vpack.c.bf16 %v786_v14, %v785_v31  ;;  %v580_v7 = vadd.f32 %v564_v30, %v527_v52  ;;  %v704_v47 = vld [vmem:[#allocation2 + $0xe1] sm:$0xff] }
  0x6f   : > { %v581_v27 = vadd.f32 %v565_v26, %v528_v4  ;;  %v756_v44 = vld [vmem:[#allocation2 + $0xda] sm:$0xff]  ;;  %v757_v39 = vld [vmem:[#allocation2 + $0xe2] sm:$0xff]  ;;  %v724_v19 = vmul.f32 %v1583_v53, %v703_v28  ;;  %v725_v45 = vmul.f32 %v1583_v53, %v704_v47 }
  0x70   : > { %1154 = vmatmul.mubr.bf16.gmra.mxu0 %v798_v46  ;;  %v633_v2 = vadd.f32 %v617_v12, %v580_v7  ;;  %v777_v24 = vmul.f32 %v1604_v63, %v756_v44  ;;  %v778_v34 = vmul.f32 %v1604_v63, %v757_v39 }
  0x71   : > { %v634_v42 = vadd.f32 %v618_v25, %v581_v27 }
  0x72   : > { %v687_v38 = vadd.f32 %v671_v62, %v633_v2 }
  0x73   : > { %v688_v29 = vadd.f32 %v672_v43, %v634_v42 }
  0x74   : > { %v740_v13 = vadd.f32 %v724_v19, %v687_v38 }
  0x75   : > { %v741_v33 = vadd.f32 %v725_v45, %v688_v29 }
  0x76   : > { %v793_v23 = vadd.f32 %v777_v24, %v740_v13 }
  0x77   : > { %v794_v20 = vadd.f32 %v778_v34, %v741_v33 }
  0x79   : > { %v802_v51 = vpack.c.bf16 %v794_v20, %v793_v23 }
  0x7b   : > { %1162 = vmatmul.mubr.bf16.gmra.mxu1 %v802_v51 }
 0x10c   : > { %v1151_v53 = vpop.f32.mrf.mxu0 }
 0x10d   : > { %v917_v60 = vadd.f32 %v1151_v53, %v1100_v40 }
 0x10e   : > { %v908_v55 = vpop.f32.mrf.mxu0 }
 0x10f   : > { %973 = vst [vmem:[%s2006_s25 + $0x10] sm:$0xff] %v917_v60  ;;  %v909_v63 = vadd.f32 %v1100_v40, %v908_v55 }
 0x110   : > { %v1152_v9 = vpop.f32.mrf.mxu0 }
 0x111   : > { %971 = vst [vmem:[%s2006_s25] sm:$0xff] %v909_v63  ;;  %v920_v58 = vadd.f32 %v1152_v9, %v1100_v40 }
 0x112   : > { %v911_v3 = vpop.f32.mrf.mxu0 }
 0x113   : > { %974 = vst [vmem:[%s2006_s25 + $0x18] sm:$0xff] %v920_v58  ;;  %v912_v1 = vadd.f32 %v1100_v40, %v911_v3 }
 0x115   : > { %972 = vst [vmem:[%s2006_s25 + $0x8] sm:$0xff] %v912_v1 }
 0x117   : > { %v1159_v11 = vpop.f32.mrf.mxu1 }
 0x118   : > { %v949_v49 = vadd.f32 %v1159_v11, %v1100_v40 }
 0x119   : > { %v940_v41 = vpop.f32.mrf.mxu1 }
 0x11a   : > { %981 = vst [vmem:[%s2006_s25 + $0x50] sm:$0xff] %v949_v49  ;;  %v941_v5 = vadd.f32 %v1100_v40, %v940_v41 }
 0x11b   : > { %v1160_v35 = vpop.f32.mrf.mxu1 }
 0x11c   : > { %979 = vst [vmem:[%s2006_s25 + $0x40] sm:$0xff] %v941_v5  ;;  %v952_v36 = vadd.f32 %v1160_v35, %v1100_v40 }
 0x11d   : > { %v943_v22 = vpop.f32.mrf.mxu1 }
 0x11e   : > { %982 = vst [vmem:[%s2006_s25 + $0x58] sm:$0xff] %v952_v36  ;;  %v944_v48 = vadd.f32 %v1100_v40, %v943_v22 }
 0x120   : > { %980 = vst [vmem:[%s2006_s25 + $0x48] sm:$0xff] %v944_v48 }
 0x130   : > { %v1155_v50 = vpop.f32.mrf.mxu0 }
 0x131   : > { %v933_v0 = vadd.f32 %v1155_v50, %v1100_v40 }
 0x132   : > { %v924_v15 = vpop.f32.mrf.mxu0 }
 0x133   : > { %977 = vst [vmem:[%s2006_s25 + $0x30] sm:$0xff] %v933_v0  ;;  %v925_v18 = vadd.f32 %v1100_v40, %v924_v15 }
 0x134   : > { %v1156_v6 = vpop.f32.mrf.mxu0 }
 0x135   : > { %975 = vst [vmem:[%s2006_s25 + $0x20] sm:$0xff] %v925_v18  ;;  %v936_v8 = vadd.f32 %v1156_v6, %v1100_v40 }
 0x136   : > { %v927_v37 = vpop.f32.mrf.mxu0 }
 0x137   : > { %978 = vst [vmem:[%s2006_s25 + $0x38] sm:$0xff] %v936_v8  ;;  %v928_v54 = vadd.f32 %v1100_v40, %v927_v37 }
 0x139   : > { %976 = vst [vmem:[%s2006_s25 + $0x28] sm:$0xff] %v928_v54 }
 0x13b   : > { %v1163_v59 = vpop.f32.mrf.mxu1 }
 0x13c   : > { %v965_v32 = vadd.f32 %v1163_v59, %v1100_v40 }
 0x13d   : > { %v956_v21 = vpop.f32.mrf.mxu1 }
 0x13e   : > { %985 = vst [vmem:[%s2006_s25 + $0x70] sm:$0xff] %v965_v32  ;;  %v957_v16 = vadd.f32 %v1100_v40, %v956_v21 }
 0x13f   : > { %v1164_v10 = vpop.f32.mrf.mxu1 }
 0x140   : > { %983 = vst [vmem:[%s2006_s25 + $0x60] sm:$0xff] %v957_v16  ;;  %v968_v56 = vadd.f32 %v1164_v10, %v1100_v40 }
 0x141   : > { %v959_v30 = vpop.f32.mrf.mxu1 }
 0x142   : > { %986 = vst [vmem:[%s2006_s25 + $0x78] sm:$0xff] %v968_v56  ;;  %v960_v17 = vadd.f32 %v1100_v40, %v959_v30 }
 0x144   : > { %984 = vst [vmem:[%s2006_s25 + $0x68] sm:$0xff] %v960_v17 }
 0x145   : > { %1276 = shalt.err (!%p1273_p6)
}
 0x146   : > { %s1277_s12 = scalar_lea.hbm %s2028_s2, 2048  ;;  %s1281_s29 = scalar_lea.hbm %s2092_s5, 8192 }
 0x147   : > { %p1278_p7 = scmp.ne.s32.totalorder %s2028_s2, %s1277_s12  ;;  %p1282_p11 = scmp.lt.s32.totalorder %s2028_s2, %s2092_s5 }
 0x148   : > { %p1283_p12 = scmp.lt.s32.totalorder %s1281_s29, %s1277_s12 }
 0x149   : > { %p1279_p9 = pnand %p1278_p7, %p1441_p3 }
 0x14a   : > { %p1284_p13 = por %p1283_p12, %p1282_p11 }
 0x14b   : > { %p1280_p10 = pneg %p1279_p9 }
 0x14d   : > { %p1285_p0 = pnand %p1284_p13, %p1280_p10 }
 0x14f   : > { %1288 = shalt.err (!%p1285_p0)
}
 0x150   : > { %s1358_s11 = smov 128   ;;  %s1359_s21 = smov 8  }
 0x151   : > { %1182 = dma.vmem_to_hbm [thread:$0]  (%p1441_p3), %s2030_s9, 2048, %s2028_s2, %s2036_s13, %s1358_s11, %s1358_s11, %s1359_s21  }
 0x152 PF: > { %p1188_p1 = scmp.ge.s32.totalorder %s1355_s24, 2  ;;  %s1019_s14 = sand.u32 1, %s1327_s18  }
 0x153   : > { %s1020_s15 = scalar_lea.sflag [#allocation4], %s1019_s14 }
 0x154   : > { %p1185_p2 = pnand %p1188_p1, %p1450_p8 }
 0x156   : > { %p1186_p4 = pneg %p1185_p2 }
 0x158   : > { %1322 = dma.done.wait (%p1186_p4), %s1020_s15, 2048  }
 0x159   : > { %1324 = vsyncadd (%p1186_p4), %s1020_s15, 4294965248  ;;  %s18_s24 = sadd.s32 1, %s1355_s24   ;;  %s2155_s18 = smov %s1331_s19 }
 0x15a   : > { %p15_p5 = scmp.ge.s32.totalorder %s18_s24, 6   ;;  %s2156_s19 = smov %s1335_s20 }
 0x15b   : > { %s2157_s20 = smov %s1459_s10  ;;  %s2158_s21 = smov %s1347_s22 }
 0x15c   : > { %s2159_s2 = smov %s1351_s23  ;;  %s2160_s22 = smov %s2163_s27 }
 0x15d   : > { %s2161_s23 = smov %s2167_s28  ;;  %17 = sbr.rel (!%p15_p5) target bundleno = 5 (0x5), region = 78 }
 0x162   :  { %1025 = vsyncpa [#allocation4], 1 }
 0x163   :  { %1027 = vsyncpa [#allocation4 + $0x1], 1 }

</bundles_post_ra>
